<compile_context>
chip_gen: v6e
topology: v6e:2x2x1
jax: 0.10.0
libtpu: 0.0.40
codegen_flags: <defaults>
</compile_context>

<pallas_src>
import math

import jax
import jax.numpy as jnp
from jax import lax
from jax.experimental import pallas as pl
from jax.experimental.pallas import tpu as pltpu

# ---- module hyper-parameters (fixed, compiled into the kernel) --------------
IN_FEATURES = 32
OUT_FEATURES = 32
ALPHA = 0.2          # negative slope of self.leakyrelu
NEG_INF = -9000000000000000.0
# transfer=True, concat=True, bias=False, dropout=0.0 (inference: F.dropout == identity)


def _hgat_kernel(x_ref, adj_ref, params_ref, node_ref, att_edge_ref):
    """One batch *block* of Bt elements per grid step.

    x_ref        (Bt*N2, Fin)  f32   batch-flattened node features
    adj_ref      (Bt, N1, N2)  int8  0/1 incidence mask
    params_ref   (Fin, out+2)  f32   [ W | W2@a2[:out] | W@(W3@a2[out:]) ]
    node_ref     (Bt, N2, out) f32
    att_edge_ref (Bt, N1, N2)  f32
    """
    bt, n1, n2 = adj_ref.shape

    # ---- shared projection: ONE MXU matmul over all Bt*N2 rows (fills sublanes) ----
    proj = jnp.dot(x_ref[...], params_ref[...],
                   preferred_element_type=jnp.float32)            # (Bt*N2, out+2)

    # ---- adj-dependent part, per batch element (Bt is small and static) ----
    for b in range(bt):
        proj_b = proj[b * n2:(b + 1) * n2, :]                     # (N2, out+2)
        sx = proj_b[:, OUT_FEATURES:OUT_FEATURES + 1]             # (N2, 1) = x_4att @ a2[:out]
        q = proj_b[:, OUT_FEATURES + 1:OUT_FEATURES + 2]          # (N2, 1) = xt @ (W3 @ a2[out:])

        mask = adj_ref[b].astype(jnp.float32)                     # (N1, N2) 0/1 mask

        # edge attention: softmax(where(adj>0, 1, -9e15)) == row-normalized mask
        deg_e = jnp.sum(mask, axis=1, keepdims=True)              # (N1, 1), lane reduce
        att_edge = jnp.where(deg_e > 0.0,
                             mask * (1.0 / jnp.maximum(deg_e, 1.0)),
                             1.0 / n2)                            # empty hyperedge -> uniform
        att_edge_ref[b] = att_edge

        # edge = att_edge @ xt  (xt = lanes [0,out) of proj_b; the 2 extra lanes ride free)
        edge = jnp.dot(att_edge, proj_b,
                       preferred_element_type=jnp.float32)[:, 0:OUT_FEATURES]   # (N1, out)

        # se[i] = (att_edge @ q)[i] = edge_4att[i] . a2[out:], built lane-oriented from
        # mask^T via sublane reduces (no sublane->lane relayout, no transposed dot_general)
        mask_t = mask.T                                           # (N2, N1), one XLU transpose
        deg_lane = jnp.sum(mask_t, axis=0, keepdims=True)         # (1, N1), sublane reduce
        q_sum = jnp.sum(mask_t * q, axis=0, keepdims=True)        # (1, N1)
        q_mean = jnp.sum(q, axis=0, keepdims=True) * (1.0 / n2)   # (1, 1): empty-edge fallback
        se_row = jnp.where(deg_lane > 0.0,
                           q_sum / jnp.maximum(deg_lane, 1.0), q_mean)          # (1, N1)

        # node attention, built directly in (N2, N1) orientation -> lane-axis softmax
        pre = sx + se_row                                         # (N2, N1)
        e = jnp.where(pre > 0.0, pre, ALPHA * pre)                # LeakyReLU(alpha)
        att2 = jnp.where(mask_t > 0.0, e, NEG_INF)
        m2 = jnp.max(att2, axis=1, keepdims=True)
        p2 = jnp.exp(att2 - m2)
        s2 = jnp.sum(p2, axis=1, keepdims=True)
        att_node = p2 * pl.reciprocal(s2, approx=True)            # EUP reciprocal

        node = jnp.dot(att_node, edge, preferred_element_type=jnp.float32)      # (N2, out)
        node = jnp.where(node > 0.0, node, 0.01 * node)           # concat=True: F.leaky_relu

        # F.normalize(node, p=2, dim=1): L2 over the node axis, per feature column
        # (matches the batched dense reference; see correctness note in the wrapper)
        sumsq = jnp.sum(node * node, axis=0, keepdims=True)       # (1, out), sublane reduce
        node_ref[b] = node * lax.rsqrt(jnp.maximum(sumsq, 1e-24))


def hgat_forward(x, adj, params):
    """x: (B, N2, Fin), adj: (B, N1, N2) (only adj > 0 matters) ->
       (F.normalize(node, dim=1) of shape (B, N2, out), attention_edge (B, N1, N2))."""
    B, N2, fin = x.shape
    N1 = adj.shape[1]
    assert fin == IN_FEATURES and adj.shape == (B, N1, N2)

    # Fold a2 / W2 / W3 into two extra columns packed next to W (done once by XLA):
    #   sx column: W2 @ a2[:out]           so  x @ col == x_4att @ a2[:out]
    #   q  column: W @ (W3 @ a2[out:])     so  x @ col == xt @ W3 @ a2[out:]
    a2 = params["a2"].astype(jnp.float32)
    w = params["weight"].astype(jnp.float32)
    v_x = params["weight2"].astype(jnp.float32) @ a2[:OUT_FEATURES]              # (Fin, 1)
    q_w = w @ (params["weight3"].astype(jnp.float32) @ a2[OUT_FEATURES:])        # (Fin, 1)
    packed = jnp.concatenate([w, v_x, q_w], axis=1)                              # (Fin, out+2)

    # adj only feeds compares, never the MXU -> ship it as an int8 0/1 mask (4x smaller)
    adj_mask = (adj > 0).astype(jnp.int8)

    # Batch-blocked grid: as few steps as possible (per-step overhead ~0.35us), but keep
    # >= 2 steps whenever B >= 2 so both TensorCores get work on v7x (megacore).
    bt = B // 2 if (B >= 2 and B % 2 == 0) else 1
    n_steps = B // bt

    x2d = x.astype(jnp.float32).reshape(B * N2, IN_FEATURES)      # free metadata reshape

    cost = pl.CostEstimate(
        flops=2 * B * (N2 * IN_FEATURES * (OUT_FEATURES + 2)
                       + N1 * N2 * (OUT_FEATURES + 2)
                       + N2 * N1 * OUT_FEATURES),
        transcendentals=B * (N1 * N2 + N2 + OUT_FEATURES),
        bytes_accessed=(B * N2 * IN_FEATURES * 4                  # x in
                        + B * N1 * N2 * (1 + 4)                   # adj (i8) in + att_edge out
                        + IN_FEATURES * (OUT_FEATURES + 2) * 4    # packed params
                        + B * N2 * OUT_FEATURES * 4),             # node out
    )

    node, att_edge = pl.pallas_call(
        _hgat_kernel,
        grid=(n_steps,),
        out_shape=(jax.ShapeDtypeStruct((B, N2, OUT_FEATURES), jnp.float32),
                   jax.ShapeDtypeStruct((B, N1, N2), jnp.float32)),
        in_specs=[
            pl.BlockSpec((bt * N2, IN_FEATURES), lambda s: (s, 0)),
            pl.BlockSpec((bt, N1, N2), lambda s: (s, 0, 0)),
            pl.BlockSpec((IN_FEATURES, OUT_FEATURES + 2), lambda s: (0, 0)),
        ],
        out_specs=(
            pl.BlockSpec((bt, N2, OUT_FEATURES), lambda s: (s, 0, 0)),
            pl.BlockSpec((bt, N1, N2), lambda s: (s, 0, 0)),
        ),
        compiler_params=pltpu.CompilerParams(dimension_semantics=("parallel",)),
        cost_estimate=cost,
    )(x2d, adj_mask, packed)
    return node, att_edge


def _ref_forward(x, adj, params):
    """Pure-JAX reference mirroring the PyTorch forward (eval mode), batched per element.

    Note: F.normalize(node, p=2, dim=1) is applied over the node axis (dim=1 of the
    (B, N2, out) tensor), matching the module's batched call."""
    x_4att = x @ params["weight2"]
    xt = x @ params["weight"]
    attention_edge = jax.nn.softmax(jnp.where(adj > 0, 1.0, NEG_INF), axis=2)
    edge = attention_edge @ xt
    edge_4att = edge @ params["weight3"]
    a2 = params["a2"]
    sx = x_4att @ a2[:OUT_FEATURES]          # (B, N2, 1)
    se = edge_4att @ a2[OUT_FEATURES:]       # (B, N1, 1)
    pre = se + jnp.swapaxes(sx, 1, 2)        # (B, N1, N2)
    e = jnp.where(pre > 0, pre, ALPHA * pre)
    att2 = jnp.where(adj > 0, e, NEG_INF)
    attention_node = jax.nn.softmax(jnp.swapaxes(att2, 1, 2), axis=2)
    node = attention_node @ edge
    node = jnp.where(node > 0, node, 0.01 * node)                    # concat=True
    norm = jnp.sqrt(jnp.sum(node * node, axis=1, keepdims=True))
    return node / jnp.maximum(norm, 1e-12), attention_edge


if __name__ == "__main__":
    key = jax.random.PRNGKey(0)
    ks = jax.random.split(key, 10)
    stdv = 1.0 / math.sqrt(OUT_FEATURES)

    B, N1, N2 = 4, 8, 16   # 4 batches (-> 2 grid steps of 2), 8 hyperedges, 16 nodes

    # deterministic parameter init matching reset_parameters(): uniform(-stdv, stdv)
    params = {
        "weight":   jax.random.uniform(ks[0], (IN_FEATURES, OUT_FEATURES), jnp.float32, -stdv, stdv),
        "weight2":  jax.random.uniform(ks[1], (IN_FEATURES, OUT_FEATURES), jnp.float32, -stdv, stdv),
        "weight3":  jax.random.uniform(ks[2], (OUT_FEATURES, OUT_FEATURES), jnp.float32, -stdv, stdv),
        # parameters below exist in the module but do not influence the returned values:
        "weight_e": jax.random.uniform(ks[3], (IN_FEATURES, OUT_FEATURES), jnp.float32, -stdv, stdv),
        "a":        jax.random.uniform(ks[4], (2 * OUT_FEATURES, 1), jnp.float32, -stdv, stdv),
        "word_context": jax.random.uniform(ks[5], (1, OUT_FEATURES), jnp.float32, -stdv, stdv),
        "a2":       jax.random.uniform(ks[6], (2 * OUT_FEATURES, 1), jnp.float32, -stdv, stdv),
    }

    x = jax.random.normal(ks[7], (B, N2, IN_FEATURES), dtype=jnp.float32)
    adj = (jax.random.uniform(ks[8], (B, N1, N2)) > 0.6).astype(jnp.float32)
    # exercise the degenerate softmax paths: an empty hyperedge and a node with no edges
    adj = adj.at[0, 0, :].set(0.0)
    adj = adj.at[1, :, 3].set(0.0)
    adj = adj.at[3, 5, :].set(0.0)

    node, att_edge = hgat_forward(x, adj, params)
    jax.block_until_ready((node, att_edge))

    node_ref, att_edge_ref = _ref_forward(x, adj, params)
    # att_edge is computed exactly (mask normalization == constant softmax)
    assert jnp.allclose(att_edge, att_edge_ref, atol=1e-6, rtol=1e-6), "attention_edge mismatch vs reference"
    # node tolerance covers the EUP approximate reciprocal / rsqrt (set approx=False for ~1e-6 parity)
    assert jnp.allclose(node, node_ref, atol=2e-3, rtol=2e-3), "node mismatch vs reference"

    print("KERNEL_OK")
</pallas_src>

<mosaic_0001>
module attributes {stable_mosaic.version = 11 : i64} {
  func.func @_hgat_kernel(%arg0: i32, %arg1: memref<32x32xf32, #tpu.memory_space<vmem>>, %arg2: memref<2x8x16xi8, #tpu.memory_space<vmem>>, %arg3: memref<32x34xf32, #tpu.memory_space<vmem>>, %arg4: memref<2x16x32xf32, #tpu.memory_space<vmem>>, %arg5: memref<2x8x16xf32, #tpu.memory_space<vmem>>) attributes {dimension_semantics = [#tpu.dimension_semantics<parallel>], iteration_bounds = array<i64: 2>, scalar_prefetch = 0 : i64, scratch_operands = 0 : i64, tpu.core_type = #tpu.core_type<tc>, window_params = [{transform_indices = @transform_0, window_bounds = array<i64: 32, 32>}, {transform_indices = @transform_1, window_bounds = array<i64: 2, 8, 16>}, {pipeline_mode = #tpu.pipeline_mode<synchronous>, transform_indices = @transform_2, window_bounds = array<i64: 32, 34>}, {transform_indices = @transform_3, window_bounds = array<i64: 2, 16, 32>}, {transform_indices = @transform_4, window_bounds = array<i64: 2, 8, 16>}]} {
    %c0 = arith.constant 0 : index
    %c0_0 = arith.constant 0 : index
    %0 = vector.load %arg1[%c0, %c0_0] : memref<32x32xf32, #tpu.memory_space<vmem>>, vector<32x32xf32>
    %c0_1 = arith.constant 0 : index
    %c0_2 = arith.constant 0 : index
    %1 = vector.load %arg3[%c0_1, %c0_2] : memref<32x34xf32, #tpu.memory_space<vmem>>, vector<32x34xf32>
    %cst = arith.constant dense<0.000000e+00> : vector<32x34xf32>
    %2 = tpu.matmul %0, %1, %cst {dimension_numbers = #tpu.dot_dimension_numbers<[1], [0], [0], [1], [0, 0, 1, 1], [], []>} : vector<32x32xf32>, vector<32x34xf32>, vector<32x34xf32> -> vector<32x34xf32>
    %3 = vector.extract_strided_slice %2 {offsets = [0, 0], sizes = [16, 34], strides = [1, 1]} : vector<32x34xf32> to vector<16x34xf32>
    %4 = vector.extract_strided_slice %3 {offsets = [0, 32], sizes = [16, 1], strides = [1, 1]} : vector<16x34xf32> to vector<16x1xf32>
    %5 = vector.extract_strided_slice %3 {offsets = [0, 33], sizes = [16, 1], strides = [1, 1]} : vector<16x34xf32> to vector<16x1xf32>
    %c0_3 = arith.constant 0 : index
    %c0_4 = arith.constant 0 : index
    %c0_5 = arith.constant 0 : index
    %6 = vector.load %arg2[%c0_3, %c0_4, %c0_5] : memref<2x8x16xi8, #tpu.memory_space<vmem>>, vector<1x8x16xi8>
    %7 = vector.shape_cast %6 : vector<1x8x16xi8> to vector<8x16xi8>
    %8 = arith.sitofp %7 : vector<8x16xi8> to vector<8x16xf32>
    %cst_6 = arith.constant dense<0.000000e+00> : vector<8xf32>
    %9 = vector.multi_reduction <add>, %8, %cst_6 [1] : vector<8x16xf32> to vector<8xf32>
    %10 = vector.shape_cast %9 : vector<8xf32> to vector<8x1xf32>
    %cst_7 = arith.constant 0.000000e+00 : f32
    %11 = vector.broadcast %cst_7 : f32 to vector<8x1xf32>
    %12 = arith.cmpf ogt, %10, %11 : vector<8x1xf32>
    %cst_8 = arith.constant 1.000000e+00 : f32
    %13 = vector.broadcast %cst_8 : f32 to vector<8x1xf32>
    %14 = arith.maximumf %10, %13 : vector<8x1xf32>
    %cst_9 = arith.constant 1.000000e+00 : f32
    %15 = vector.broadcast %cst_9 : f32 to vector<8x1xf32>
    %16 = arith.divf %15, %14 : vector<8x1xf32>
    %17 = vector.broadcast %16 : vector<8x1xf32> to vector<8x16xf32>
    %18 = arith.mulf %8, %17 : vector<8x16xf32>
    %cst_10 = arith.constant 6.250000e-02 : f32
    %19 = vector.shape_cast %12 : vector<8x1xi1> to vector<8x1xi1>
    %20 = vector.broadcast %19 : vector<8x1xi1> to vector<8x16xi1>
    %21 = vector.broadcast %cst_10 : f32 to vector<8x16xf32>
    %22 = arith.select %20, %18, %21 : vector<8x16xi1>, vector<8x16xf32>
    %c0_11 = arith.constant 0 : index
    %c0_12 = arith.constant 0 : index
    %c0_13 = arith.constant 0 : index
    %23 = vector.load %arg5[%c0_11, %c0_12, %c0_13] : memref<2x8x16xf32, #tpu.memory_space<vmem>>, vector<1x8x16xf32>
    %24 = vector.shape_cast %23 : vector<1x8x16xf32> to vector<8x16xf32>
    %25 = vector.shape_cast %22 : vector<8x16xf32> to vector<1x8x16xf32>
    tpu.vector_store %arg5[%c0_11, %c0_12, %c0_13], %25 {strides = array<i32>} : memref<2x8x16xf32, #tpu.memory_space<vmem>>, vector<1x8x16xf32>,
    %cst_14 = arith.constant dense<0.000000e+00> : vector<8x34xf32>
    %26 = tpu.matmul %22, %3, %cst_14 {dimension_numbers = #tpu.dot_dimension_numbers<[1], [0], [0], [1], [0, 0, 1, 1], [], []>} : vector<8x16xf32>, vector<16x34xf32>, vector<8x34xf32> -> vector<8x34xf32>
    %27 = vector.extract_strided_slice %26 {offsets = [0, 0], sizes = [8, 32], strides = [1, 1]} : vector<8x34xf32> to vector<8x32xf32>
    %28 = tpu.transpose %8, [1, 0] : vector<8x16xf32> -> vector<16x8xf32>
    %cst_15 = arith.constant dense<0.000000e+00> : vector<8xf32>
    %29 = vector.multi_reduction <add>, %28, %cst_15 [0] : vector<16x8xf32> to vector<8xf32>
    %30 = vector.shape_cast %29 : vector<8xf32> to vector<1x8xf32>
    %31 = vector.broadcast %5 : vector<16x1xf32> to vector<16x8xf32>
    %32 = arith.mulf %28, %31 : vector<16x8xf32>
    %cst_16 = arith.constant dense<0.000000e+00> : vector<8xf32>
    %33 = vector.multi_reduction <add>, %32, %cst_16 [0] : vector<16x8xf32> to vector<8xf32>
    %34 = vector.shape_cast %33 : vector<8xf32> to vector<1x8xf32>
    %cst_17 = arith.constant dense<0.000000e+00> : vector<1xf32>
    %35 = vector.multi_reduction <add>, %5, %cst_17 [0] : vector<16x1xf32> to vector<1xf32>
    %36 = vector.shape_cast %35 : vector<1xf32> to vector<1x1xf32>
    %cst_18 = arith.constant 6.250000e-02 : f32
    %37 = vector.broadcast %cst_18 : f32 to vector<1x1xf32>
    %38 = arith.mulf %36, %37 : vector<1x1xf32>
    %cst_19 = arith.constant 0.000000e+00 : f32
    %39 = vector.broadcast %cst_19 : f32 to vector<1x8xf32>
    %40 = arith.cmpf ogt, %30, %39 : vector<1x8xf32>
    %cst_20 = arith.constant 1.000000e+00 : f32
    %41 = vector.broadcast %cst_20 : f32 to vector<1x8xf32>
    %42 = arith.maximumf %30, %41 : vector<1x8xf32>
    %43 = arith.divf %34, %42 : vector<1x8xf32>
    %44 = vector.shape_cast %38 : vector<1x1xf32> to vector<1x1xf32>
    %45 = vector.broadcast %44 : vector<1x1xf32> to vector<1x8xf32>
    %46 = arith.select %40, %43, %45 : vector<1x8xi1>, vector<1x8xf32>
    %47 = vector.broadcast %4 : vector<16x1xf32> to vector<16x8xf32>
    %48 = vector.broadcast %46 : vector<1x8xf32> to vector<16x8xf32>
    %49 = arith.addf %47, %48 : vector<16x8xf32>
    %cst_21 = arith.constant 0.000000e+00 : f32
    %50 = vector.broadcast %cst_21 : f32 to vector<16x8xf32>
    %51 = arith.cmpf ogt, %49, %50 : vector<16x8xf32>
    %cst_22 = arith.constant 2.000000e-01 : f32
    %52 = vector.broadcast %cst_22 : f32 to vector<16x8xf32>
    %53 = arith.mulf %52, %49 : vector<16x8xf32>
    %54 = arith.select %51, %49, %53 : vector<16x8xi1>, vector<16x8xf32>
    %cst_23 = arith.constant 0.000000e+00 : f32
    %55 = vector.broadcast %cst_23 : f32 to vector<16x8xf32>
    %56 = arith.cmpf ogt, %28, %55 : vector<16x8xf32>
    %cst_24 = arith.constant -9.000000e+15 : f32
    %57 = vector.broadcast %cst_24 : f32 to vector<16x8xf32>
    %58 = arith.select %56, %54, %57 : vector<16x8xi1>, vector<16x8xf32>
    %cst_25 = arith.constant dense<0xFF800000> : vector<16xf32>
    %59 = vector.multi_reduction <maximumf>, %58, %cst_25 [1] : vector<16x8xf32> to vector<16xf32>
    %60 = vector.shape_cast %59 : vector<16xf32> to vector<16x1xf32>
    %61 = vector.broadcast %60 : vector<16x1xf32> to vector<16x8xf32>
    %62 = arith.subf %58, %61 : vector<16x8xf32>
    %63 = math.exp %62 : vector<16x8xf32>
    %cst_26 = arith.constant dense<0.000000e+00> : vector<16xf32>
    %64 = vector.multi_reduction <add>, %63, %cst_26 [1] : vector<16x8xf32> to vector<16xf32>
    %65 = vector.shape_cast %64 : vector<16xf32> to vector<16x1xf32>
    %66 = tpu.reciprocal %65 {approx = true} : vector<16x1xf32> -> vector<16x1xf32>
    %67 = vector.broadcast %66 : vector<16x1xf32> to vector<16x8xf32>
    %68 = arith.mulf %63, %67 : vector<16x8xf32>
    %cst_27 = arith.constant dense<0.000000e+00> : vector<16x32xf32>
    %69 = tpu.matmul %68, %27, %cst_27 {dimension_numbers = #tpu.dot_dimension_numbers<[1], [0], [0], [1], [0, 0, 1, 1], [], []>} : vector<16x8xf32>, vector<8x32xf32>, vector<16x32xf32> -> vector<16x32xf32>
    %cst_28 = arith.constant 0.000000e+00 : f32
    %70 = vector.broadcast %cst_28 : f32 to vector<16x32xf32>
    %71 = arith.cmpf ogt, %69, %70 : vector<16x32xf32>
    %cst_29 = arith.constant 0.00999999977 : f32
    %72 = vector.broadcast %cst_29 : f32 to vector<16x32xf32>
    %73 = arith.mulf %72, %69 : vector<16x32xf32>
    %74 = arith.select %71, %69, %73 : vector<16x32xi1>, vector<16x32xf32>
    %75 = arith.mulf %74, %74 : vector<16x32xf32>
    %cst_30 = arith.constant dense<0.000000e+00> : vector<32xf32>
    %76 = vector.multi_reduction <add>, %75, %cst_30 [0] : vector<16x32xf32> to vector<32xf32>
    %77 = vector.shape_cast %76 : vector<32xf32> to vector<1x32xf32>
    %cst_31 = arith.constant 1.000000e-24 : f32
    %78 = vector.broadcast %cst_31 : f32 to vector<1x32xf32>
    %79 = arith.maximumf %77, %78 : vector<1x32xf32>
    %80 = math.rsqrt %79 : vector<1x32xf32>
    %81 = vector.broadcast %80 : vector<1x32xf32> to vector<16x32xf32>
    %82 = arith.mulf %74, %81 : vector<16x32xf32>
    %c0_32 = arith.constant 0 : index
    %c0_33 = arith.constant 0 : index
    %c0_34 = arith.constant 0 : index
    %83 = vector.load %arg4[%c0_32, %c0_33, %c0_34] : memref<2x16x32xf32, #tpu.memory_space<vmem>>, vector<1x16x32xf32>
    %84 = vector.shape_cast %83 : vector<1x16x32xf32> to vector<16x32xf32>
    %85 = vector.shape_cast %82 : vector<16x32xf32> to vector<1x16x32xf32>
    tpu.vector_store %arg4[%c0_32, %c0_33, %c0_34], %85 {strides = array<i32>} : memref<2x16x32xf32, #tpu.memory_space<vmem>>, vector<1x16x32xf32>,
    %86 = vector.extract_strided_slice %2 {offsets = [16, 0], sizes = [16, 34], strides = [1, 1]} : vector<32x34xf32> to vector<16x34xf32>
    %87 = vector.extract_strided_slice %86 {offsets = [0, 32], sizes = [16, 1], strides = [1, 1]} : vector<16x34xf32> to vector<16x1xf32>
    %88 = vector.extract_strided_slice %86 {offsets = [0, 33], sizes = [16, 1], strides = [1, 1]} : vector<16x34xf32> to vector<16x1xf32>
    %c1 = arith.constant 1 : index
    %c0_35 = arith.constant 0 : index
    %c0_36 = arith.constant 0 : index
    %89 = vector.load %arg2[%c1, %c0_35, %c0_36] : memref<2x8x16xi8, #tpu.memory_space<vmem>>, vector<1x8x16xi8>
    %90 = vector.shape_cast %89 : vector<1x8x16xi8> to vector<8x16xi8>
    %91 = arith.sitofp %90 : vector<8x16xi8> to vector<8x16xf32>
    %cst_37 = arith.constant dense<0.000000e+00> : vector<8xf32>
    %92 = vector.multi_reduction <add>, %91, %cst_37 [1] : vector<8x16xf32> to vector<8xf32>
    %93 = vector.shape_cast %92 : vector<8xf32> to vector<8x1xf32>
    %cst_38 = arith.constant 0.000000e+00 : f32
    %94 = vector.broadcast %cst_38 : f32 to vector<8x1xf32>
    %95 = arith.cmpf ogt, %93, %94 : vector<8x1xf32>
    %cst_39 = arith.constant 1.000000e+00 : f32
    %96 = vector.broadcast %cst_39 : f32 to vector<8x1xf32>
    %97 = arith.maximumf %93, %96 : vector<8x1xf32>
    %cst_40 = arith.constant 1.000000e+00 : f32
    %98 = vector.broadcast %cst_40 : f32 to vector<8x1xf32>
    %99 = arith.divf %98, %97 : vector<8x1xf32>
    %100 = vector.broadcast %99 : vector<8x1xf32> to vector<8x16xf32>
    %101 = arith.mulf %91, %100 : vector<8x16xf32>
    %cst_41 = arith.constant 6.250000e-02 : f32
    %102 = vector.shape_cast %95 : vector<8x1xi1> to vector<8x1xi1>
    %103 = vector.broadcast %102 : vector<8x1xi1> to vector<8x16xi1>
    %104 = vector.broadcast %cst_41 : f32 to vector<8x16xf32>
    %105 = arith.select %103, %101, %104 : vector<8x16xi1>, vector<8x16xf32>
    %c1_42 = arith.constant 1 : index
    %c0_43 = arith.constant 0 : index
    %c0_44 = arith.constant 0 : index
    %106 = vector.load %arg5[%c1_42, %c0_43, %c0_44] : memref<2x8x16xf32, #tpu.memory_space<vmem>>, vector<1x8x16xf32>
    %107 = vector.shape_cast %106 : vector<1x8x16xf32> to vector<8x16xf32>
    %108 = vector.shape_cast %105 : vector<8x16xf32> to vector<1x8x16xf32>
    tpu.vector_store %arg5[%c1_42, %c0_43, %c0_44], %108 {strides = array<i32>} : memref<2x8x16xf32, #tpu.memory_space<vmem>>, vector<1x8x16xf32>,
    %cst_45 = arith.constant dense<0.000000e+00> : vector<8x34xf32>
    %109 = tpu.matmul %105, %86, %cst_45 {dimension_numbers = #tpu.dot_dimension_numbers<[1], [0], [0], [1], [0, 0, 1, 1], [], []>} : vector<8x16xf32>, vector<16x34xf32>, vector<8x34xf32> -> vector<8x34xf32>
    %110 = vector.extract_strided_slice %109 {offsets = [0, 0], sizes = [8, 32], strides = [1, 1]} : vector<8x34xf32> to vector<8x32xf32>
    %111 = tpu.transpose %91, [1, 0] : vector<8x16xf32> -> vector<16x8xf32>
    %cst_46 = arith.constant dense<0.000000e+00> : vector<8xf32>
    %112 = vector.multi_reduction <add>, %111, %cst_46 [0] : vector<16x8xf32> to vector<8xf32>
    %113 = vector.shape_cast %112 : vector<8xf32> to vector<1x8xf32>
    %114 = vector.broadcast %88 : vector<16x1xf32> to vector<16x8xf32>
    %115 = arith.mulf %111, %114 : vector<16x8xf32>
    %cst_47 = arith.constant dense<0.000000e+00> : vector<8xf32>
    %116 = vector.multi_reduction <add>, %115, %cst_47 [0] : vector<16x8xf32> to vector<8xf32>
    %117 = vector.shape_cast %116 : vector<8xf32> to vector<1x8xf32>
    %cst_48 = arith.constant dense<0.000000e+00> : vector<1xf32>
    %118 = vector.multi_reduction <add>, %88, %cst_48 [0] : vector<16x1xf32> to vector<1xf32>
    %119 = vector.shape_cast %118 : vector<1xf32> to vector<1x1xf32>
    %cst_49 = arith.constant 6.250000e-02 : f32
    %120 = vector.broadcast %cst_49 : f32 to vector<1x1xf32>
    %121 = arith.mulf %119, %120 : vector<1x1xf32>
    %cst_50 = arith.constant 0.000000e+00 : f32
    %122 = vector.broadcast %cst_50 : f32 to vector<1x8xf32>
    %123 = arith.cmpf ogt, %113, %122 : vector<1x8xf32>
    %cst_51 = arith.constant 1.000000e+00 : f32
    %124 = vector.broadcast %cst_51 : f32 to vector<1x8xf32>
    %125 = arith.maximumf %113, %124 : vector<1x8xf32>
    %126 = arith.divf %117, %125 : vector<1x8xf32>
    %127 = vector.shape_cast %121 : vector<1x1xf32> to vector<1x1xf32>
    %128 = vector.broadcast %127 : vector<1x1xf32> to vector<1x8xf32>
    %129 = arith.select %123, %126, %128 : vector<1x8xi1>, vector<1x8xf32>
    %130 = vector.broadcast %87 : vector<16x1xf32> to vector<16x8xf32>
    %131 = vector.broadcast %129 : vector<1x8xf32> to vector<16x8xf32>
    %132 = arith.addf %130, %131 : vector<16x8xf32>
    %cst_52 = arith.constant 0.000000e+00 : f32
    %133 = vector.broadcast %cst_52 : f32 to vector<16x8xf32>
    %134 = arith.cmpf ogt, %132, %133 : vector<16x8xf32>
    %cst_53 = arith.constant 2.000000e-01 : f32
    %135 = vector.broadcast %cst_53 : f32 to vector<16x8xf32>
    %136 = arith.mulf %135, %132 : vector<16x8xf32>
    %137 = arith.select %134, %132, %136 : vector<16x8xi1>, vector<16x8xf32>
    %cst_54 = arith.constant 0.000000e+00 : f32
    %138 = vector.broadcast %cst_54 : f32 to vector<16x8xf32>
    %139 = arith.cmpf ogt, %111, %138 : vector<16x8xf32>
    %cst_55 = arith.constant -9.000000e+15 : f32
    %140 = vector.broadcast %cst_55 : f32 to vector<16x8xf32>
    %141 = arith.select %139, %137, %140 : vector<16x8xi1>, vector<16x8xf32>
    %cst_56 = arith.constant dense<0xFF800000> : vector<16xf32>
    %142 = vector.multi_reduction <maximumf>, %141, %cst_56 [1] : vector<16x8xf32> to vector<16xf32>
    %143 = vector.shape_cast %142 : vector<16xf32> to vector<16x1xf32>
    %144 = vector.broadcast %143 : vector<16x1xf32> to vector<16x8xf32>
    %145 = arith.subf %141, %144 : vector<16x8xf32>
    %146 = math.exp %145 : vector<16x8xf32>
    %cst_57 = arith.constant dense<0.000000e+00> : vector<16xf32>
    %147 = vector.multi_reduction <add>, %146, %cst_57 [1] : vector<16x8xf32> to vector<16xf32>
    %148 = vector.shape_cast %147 : vector<16xf32> to vector<16x1xf32>
    %149 = tpu.reciprocal %148 {approx = true} : vector<16x1xf32> -> vector<16x1xf32>
    %150 = vector.broadcast %149 : vector<16x1xf32> to vector<16x8xf32>
    %151 = arith.mulf %146, %150 : vector<16x8xf32>
    %cst_58 = arith.constant dense<0.000000e+00> : vector<16x32xf32>
    %152 = tpu.matmul %151, %110, %cst_58 {dimension_numbers = #tpu.dot_dimension_numbers<[1], [0], [0], [1], [0, 0, 1, 1], [], []>} : vector<16x8xf32>, vector<8x32xf32>, vector<16x32xf32> -> vector<16x32xf32>
    %cst_59 = arith.constant 0.000000e+00 : f32
    %153 = vector.broadcast %cst_59 : f32 to vector<16x32xf32>
    %154 = arith.cmpf ogt, %152, %153 : vector<16x32xf32>
    %cst_60 = arith.constant 0.00999999977 : f32
    %155 = vector.broadcast %cst_60 : f32 to vector<16x32xf32>
    %156 = arith.mulf %155, %152 : vector<16x32xf32>
    %157 = arith.select %154, %152, %156 : vector<16x32xi1>, vector<16x32xf32>
    %158 = arith.mulf %157, %157 : vector<16x32xf32>
    %cst_61 = arith.constant dense<0.000000e+00> : vector<32xf32>
    %159 = vector.multi_reduction <add>, %158, %cst_61 [0] : vector<16x32xf32> to vector<32xf32>
    %160 = vector.shape_cast %159 : vector<32xf32> to vector<1x32xf32>
    %cst_62 = arith.constant 1.000000e-24 : f32
    %161 = vector.broadcast %cst_62 : f32 to vector<1x32xf32>
    %162 = arith.maximumf %160, %161 : vector<1x32xf32>
    %163 = math.rsqrt %162 : vector<1x32xf32>
    %164 = vector.broadcast %163 : vector<1x32xf32> to vector<16x32xf32>
    %165 = arith.mulf %157, %164 : vector<16x32xf32>
    %c1_63 = arith.constant 1 : index
    %c0_64 = arith.constant 0 : index
    %c0_65 = arith.constant 0 : index
    %166 = vector.load %arg4[%c1_63, %c0_64, %c0_65] : memref<2x16x32xf32, #tpu.memory_space<vmem>>, vector<1x16x32xf32>
    %167 = vector.shape_cast %166 : vector<1x16x32xf32> to vector<16x32xf32>
    %168 = vector.shape_cast %165 : vector<16x32xf32> to vector<1x16x32xf32>
    tpu.vector_store %arg4[%c1_63, %c0_64, %c0_65], %168 {strides = array<i32>} : memref<2x16x32xf32, #tpu.memory_space<vmem>>, vector<1x16x32xf32>,
    return
  }
  func.func @transform_0(%arg0: i32) -> (i32, i32) {
    %c0_i32 = arith.constant 0 : i32
    %c0_i32_0 = arith.constant 0 : i32
    return %arg0, %c0_i32 : i32, i32
  }
  func.func @transform_1(%arg0: i32) -> (i32, i32, i32) {
    %c0_i32 = arith.constant 0 : i32
    %c0_i32_0 = arith.constant 0 : i32
    %c0_i32_1 = arith.constant 0 : i32
    return %arg0, %c0_i32, %c0_i32_0 : i32, i32, i32
  }
  func.func @transform_2(%arg0: i32) -> (i32, i32) {
    %c0_i32 = arith.constant 0 : i32
    %c0_i32_0 = arith.constant 0 : i32
    %c0_i32_1 = arith.constant 0 : i32
    return %c0_i32, %c0_i32_0 : i32, i32
  }
  func.func @transform_3(%arg0: i32) -> (i32, i32, i32) {
    %c0_i32 = arith.constant 0 : i32
    %c0_i32_0 = arith.constant 0 : i32
    %c0_i32_1 = arith.constant 0 : i32
    return %arg0, %c0_i32, %c0_i32_0 : i32, i32, i32
  }
  func.func @transform_4(%arg0: i32) -> (i32, i32, i32) {
    %c0_i32 = arith.constant 0 : i32
    %c0_i32_0 = arith.constant 0 : i32
    %c0_i32_1 = arith.constant 0 : i32
    return %arg0, %c0_i32, %c0_i32_0 : i32, i32, i32
  }
}

</mosaic_0001>

<bundles_post_ra>
// kernel: tpu_custom_call.1
= control target key start
LH: loop header
LB: loop body
LE: loop exit
PB: predicated region body
PF: predicated region fallthrough
CT: control target
= control target key end

     0   :  { %10 = vsyncpa [#allocation3], 0  ;;  %s1661_s0 = inlined_call_operand.vmem [shape: f32[64,32], index: 0, kind: input, shape index: {}]   ;;  %s1662_s1 = inlined_call_operand.vmem [shape: s8[4,8,16], index: 1, kind: input, shape index: {}]   ;;  %s1663_s2 = inlined_call_operand.vmem [shape: f32[32,34], index: 2, kind: input, shape index: {}]   ;;  %s1664_s3 = inlined_call_operand.hbm [shape: f32[4,16,32], index: 3, kind: output, shape index: {0}]   ;;  %s1665_s4 = inlined_call_operand.hbm [shape: f32[4,8,16], index: 4, kind: output, shape index: {1}]  }
   0x1   :  { %12 = vsyncpa [#allocation3 + $0x1], 0 }
   0x2   :  { %13 = vsyncpa [#allocation5], 0 }
   0x3   :  { %15 = vsyncpa [#allocation5 + $0x1], 0  ;;  %s1421_s15 = smov 0   ;;  %s1423_s16 = smov 0  }
   0x4   :  { %s1425_s17 = smov 0   ;;  %s1427_s18 = smov 0  }
   0x5 LB: > { %s1442_s19 = sadd.s32 4294967295, %s1386_s18   ;;  %s1119_s20 = sadd.s32 4294967294, %s1386_s18   ;;  %s1386_s18 = sphi %s1427_s18, %s1671_s18   ;;  %s1382_s17 = sphi %s1425_s17, %s1670_s17   ;;  %s1378_s16 = sphi %s1423_s16, %s1669_s16   ;;  %s1374_s15 = sphi %s1421_s15, %s1668_s15  }
   0x6   : > { %s1446_s21 = sadd.s32 1, %s1386_s18   ;;  %s101_s22 = sadd.s32 1, %s1382_s17 }
   0x7   : > { %s98_s23 = ssub.s32 %s1386_s18, %s1446_s21  ;;  %p111_p0 = scmp.ne.s32.totalorder %s1382_s17, %s1378_s16 }
   0x8   : > { %p99_p1 = scmp.eq.s32.totalorder %s98_s23, 0  ;;  %p112_p2 = scmp.eq.s32.totalorder %s1442_s19, 1 }
   0x9   : > { %p117_p3 = scmp.ne.s32.totalorder %s1378_s16, %s1374_s15  ;;  %p118_p4 = scmp.eq.s32.totalorder %s1119_s20, 1 }
   0xa   : > { %s1457_s24 = scalar_select %p99_p1, %s1382_s17, %s101_s22  }
   0xb   : > { %p1459_p5 = por %p112_p2, %p111_p0  ;;  %p1463_p6 = por %p118_p4, %p117_p3 }
   0xc   : > { %p1122_p7 = scmp.ge.s32.totalorder %s1386_s18, 1  ;;  %p183_p8 = scmp.lt.s32.totalorder %s1386_s18, 3 }
   0xe   : > { %p184_p9 = pnand %p1122_p7, %p183_p8 }
   0xf   : > { %s1125_s5 = sshll.u32 (!%p184_p9), %s1442_s19, 2  ;;  %s1127_s6 = sshll.u32 (!%p184_p9), %s1442_s19, 1 }
  0x10   : > { %187 = sbr.rel (%p184_p9) target bundleno = 1314 (0x522), region = 32  ;;  %p220_p10 = scmp.lt.s32.totalorder (!%p184_p9), %s1125_s5, 7 }
  0x11   : > { %p226_p11 = scmp.lt.s32.totalorder (!%p184_p9), %s1127_s6, 3  ;;  %s1499_s28 = sand.u32 (!%p184_p9), 1, %s1378_s16  }
  0x12   : > { %s1124_s29 = sshll.u32 (!%p184_p9), %s1499_s28, 4  ;;  %s1154_s8 = sshll.u32 (!%p184_p9), %s1442_s19, 8 }
  0x13   : > { %s1502_s30 = scalar_lea.vmem (!%p184_p9), [#allocation4], %s1124_s29  ;;  %s983_s12 = scalar_lea.sflag (!%p184_p9), [#allocation5], %s1499_s28 }
  0x14   : > { %s1013_s7 = sshll.u32 (!%p184_p9), %s1502_s30, 4  ;;  %s1571_s7 = int_to_ptr.vmem [resolvable:$true] %s1013_s7 }
  0x15   : > { %v240_v0 = vld [vmem:[%s1663_s2 + $0x18] sm:$0xff]  ;;  %v239_v1 = vld [vmem:[%s1663_s2 + $0x10] sm:$0xff]  ;;  %v238_v2 = vld [vmem:[%s1663_s2 + $0x8] sm:$0xff]  ;;  %v1388_v3 = vmov 33   ;;  %s1673_s5 = smov (!%p220_p10, %s1125_s5), 7  ;;  %s1675_s6 = smov (!%p226_p11, %s1127_s6), 3 }
  0x16   : > { %1175 = vmatprep.subr.mxu0 %v240_v0  ;;  %1264 = vset.pattern.permute.xlu1 %v1388_v3  ;;  %v237_v4 = vld [vmem:[%s1663_s2] sm:$0xff]  ;;  %s1126_s11 = sshll.u32 %s1673_s5, 3  ;;  %vm241_vm0 = vcmask 261120   ;;  %s1128_s20 = sshll.u32 %s1675_s6, 1  ;;  %vm342_vm1 = vcmask 130048   ;;  %v1389_v11 = vmov 0.0  }
  0x17   : > { %1176 = vmatpush3.msra.mxu0 %v240_v0  ;;  %1263 = vset.pattern.permute.xlu0 %v1388_v3  ;;  %s223_s14 = scalar_lea.vmem %s1661_s0, %s1126_s11  ;;  %s229_s27 = scalar_lea.vmem %s1662_s1, %s1128_s20  ;;  %v1390_v21 = vmov 32   ;;  %vm491_vm3 = vcmask 277768   ;;  %vm1391_vm4 = vmmov 0   ;;  %vm460_vm5 = vcmask 64512  }
  0x18   : > { %1177 = vmatprep.subr.mxu0 %v239_v1  ;;  %v233_v5 = vld [vmem:[%s223_s14] sm:$0xff]  ;;  %v234_v6 = vld [vmem:[%s223_s14 + $0x8] sm:$0xff]  ;;  %1189 = vmatprep.subr.mxu1 %v1389_v11  ;;  %v235_v12 = vld [vmem:[%s223_s14 + $0x10] sm:$0xff]  ;;  %s1123_s5 = sshll.u32 %s1499_s28, 5  ;;  %s1577_s11 = scalar_lea.hbm %s1665_s4, %s1154_s8 }
  0x19   : > { %1178 = vmatpush3.msra.mxu0 %v239_v1  ;;  %1183 = vmatprep.mubr.msk.f32.mxu0 %vm241_vm0, %v233_v5  ;;  %v1490_v7 = vld [vmem:[%s229_s27] sm:$0xf]   ;;  %v236_v13 = vld [vmem:[%s223_s14 + $0x18] sm:$0xff]  ;;  %s1562_s6 = scalar_lea.vmem [#allocation2], %s1123_s5  ;;  %s1296_s13 = scalar_lea.vmem %s1571_s7, 256 }
  0x1a   : > { %1179 = vmatprep.subr.mxu0 %v238_v2  ;;  %v340_v8 = vunpack.c.0.s8 %v1490_v7  ;;  %1193 = vmatprep.mubr.msk.f32.mxu1 %vm1391_vm4, %v1389_v11  ;;  %v660_v63 = vunpack.c.1.s8 %v1490_v7  ;;  %p1297_p12 = scmp.ne.s32.totalorder %s1571_s7, %s1296_s13  ;;  %s1392_s14 = smov [#allocation4]  }
  0x1b   : > { %1180 = vmatpush3.msra.mxu0 %v238_v2  ;;  %s1300_s20 = sshll.u32 %s1392_s14, 4  ;;  %s1301_s20 = int_to_ptr.vmem [resolvable:$false] %s1300_s20 }
  0x1c   : > { %1181 = vmatprep.subr.mxu0 %v237_v4  ;;  %v341_v9 = vcvt.s32.f32 %v340_v8  ;;  %p1298_p13 = pnand %p1297_p12, %p1459_p5  ;;  %s1302_s22 = scalar_lea.vmem %s1301_s20, 512 }
  0x1d   : > { %1182 = vmatpush3.msra.mxu0 %v237_v4  ;;  %v661_v4 = vcvt.s32.f32 %v660_v63  ;;  %p1303_p1 = scmp.lt.s32.totalorder %s1571_s7, %s1301_s20  ;;  %p1304_p2 = scmp.lt.s32.totalorder %s1302_s22, %s1296_s13 }
  0x1e   : > { %1184 = vmatmul.mubr.msk.f32.vlgmr.msra.gmra.mxu0 %vm241_vm0, %v234_v6  ;;  %v343_v10 = vsel %vm342_vm1, %v341_v9, 0.0  ;;  %p1299_p0 = pneg %p1298_p13 }
  0x1f   : > { %344 = vadd.xlane.f32.xlu0 %v343_v10  ;;  %1186 = vmatprep.mubr.msk.f32.mxu0 %vm241_vm0, %v235_v12  ;;  %v662_v7 = vsel %vm342_vm1, %v661_v4, 0.0  ;;  %p1305_p3 = por %p1304_p2, %p1303_p1 }
  0x21   : > { %p1306_p4 = pnand %p1305_p3, %p1299_p0 }
  0x22   : > { %1187 = vmatmul.mubr.msk.f32.gmra.mxu0 %vm241_vm0, %v236_v13 }
  0xa8   : > { %v345_v14 = vpop.xlane.xlu0 %344 }
  0xa9   : > { %v347_v15 = vmax.f32 %v345_v14, 1.0  ;;  %vm346_vm2 = vcmp.gt.f32.partialorder %v345_v14, 0.0 }
  0xab   : > { %1268 = vrcp.f32 %v347_v15 }
  0xb8   : > { %v1269_v16 = vpop.eup %1268 }
  0xb9   : > { %v350_v17 = vmul.f32 %v1269_v16, %v341_v9 }
  0xbb   : > { %v353_v18 = vsel %vm346_vm2, %v350_v17, 0.0625 }
  0xbc   : > { %354 = vst.msk [vmem:[%s1502_s30] sm:$0xff] %vm342_vm1, %v353_v18 }
  0xde   : > { %v1185_v19 = vpop.f32.mrf.mxu0 }
  0xdf   : > { %477 = vperm.xlu1 %1264, %v1185_v19   ;;  %1190 = vmatpush3.msra.mxu1 %v1185_v19  ;;  %v493_v23 = vsel %vm491_vm3, %v1185_v19, 0.0 }
  0xe0   : > { %v320_v20 = vpop.f32.mrf.mxu0  ;;  %1191 = vmatprep.subr.mxu1 %v1389_v11 }
  0xe1   : > { %472 = vperm.xlu0 %1263, %v320_v20   ;;  %1192 = vmatpush3.msra.mxu1 %v320_v20  ;;  %v492_v22 = vsel %vm491_vm3, %v320_v20, 0.0 }
  0xe2   : > { %v494_v24 = vadd.f32 %v493_v23, %v492_v22  ;;  %1194 = vmatmul.mubr.msk.f32.vlgmr.msra.gmra.mxu1 %vm342_vm1, %v353_v18  ;;  %v1521_v13 = vpop.f32.mrf.mxu0 }
  0xe4   : > { %v495_v25 = vrot.slane %v494_v24, 4  ;;  %v1524_v14 = vpop.f32.mrf.mxu0 }
  0xe5   : > { %1265 = vset.pattern.permute.xlu0 %v1390_v21 }
  0xe6   : > { %513 = vperm.xlu0 %1265, %v320_v20   ;;  %v496_v26 = vadd.f32 %v495_v25, %v494_v24 }
  0xe8   : > { %v497_v27 = vrot.slane %v496_v26, 2 }
  0xea   : > { %517 = vperm.xlu0 %1265, %v1185_v19   ;;  %v498_v28 = vadd.f32 %v497_v27, %v496_v26  ;;  %v811_v26 = vsel %vm491_vm3, %v1521_v13, 0.0  ;;  %v810_v27 = vsel %vm491_vm3, %v1524_v14, 0.0 }
  0xec   : > { %v499_v29 = vrot.slane %v498_v28, 1 }
  0xee   : > { %1266 = vset.pattern.permute.xlu0 %v1388_v3  ;;  %v500_v30 = vadd.f32 %v499_v29, %v498_v28  ;;  %v812_v28 = vadd.f32 %v811_v26, %v810_v27 }
  0xf0   : > { %v501_v31 = vmul.f32 0.0625, %v500_v30 }
 0x108   : > { %428 = vxpose.xlu1.b32.start.end [1/1] (short) (narrow) %v341_v9, 16 }
 0x12a   : > { %508 = vperm.xlu1 %1264, %v501_v31  }
 0x15a   : > { %v478_v32 = vpop.permute.xlu1 %477 }
 0x15c   : > { %v473_v34 = vpop.permute.xlu0 %472 }
 0x161   : > { %v514_v56 = vpop.permute.xlu0 %513 }
 0x165   : > { %v518_v61 = vpop.permute.xlu0 %517 }
 0x184   : > { %v444_v33 = vpop.trf.xlu1 }
 0x185   : > { %v461_v36 = vsel %vm460_vm5, %v444_v33, 0.0  ;;  %v480_v37 = vmul.f32 %v473_v34, %v444_v33  ;;  %vm528_vm10 = vcmp.gt.f32.partialorder %v444_v33, 0.0  ;;  %v813_v33 = vrot.slane %v812_v28, 4 }
 0x187   : > { %v482_v43 = vsel %vm460_vm5, %v480_v37, 0.0  ;;  %v814_v37 = vadd.f32 %v813_v33, %v812_v28 }
 0x188   : > { %v445_v35 = vpop.trf.xlu1 }
 0x189   : > { %v462_v38 = vsel %vm460_vm5, %v445_v35, 0.0  ;;  %v481_v39 = vmul.f32 %v478_v32, %v445_v35  ;;  %vm529_vm9 = vcmp.gt.f32.partialorder %v445_v35, 0.0 }
 0x18a   : > { %v463_v40 = vadd.f32 %v462_v38, %v461_v36  ;;  %v815_v38 = vrot.slane %v814_v37, 2 }
 0x18b   : > { %v483_v41 = vsel %vm460_vm5, %v481_v39, 0.0 }
 0x18c   : > { %v464_v42 = vrot.slane %v463_v40, 4  ;;  %v484_v45 = vadd.f32 %v483_v41, %v482_v43  ;;  %v816_v39 = vadd.f32 %v815_v38, %v814_v37 }
 0x18e   : > { %v465_v44 = vadd.f32 %v464_v42, %v463_v40  ;;  %v485_v47 = vrot.slane %v484_v45, 4  ;;  %v817_v40 = vrot.slane %v816_v39, 1 }
 0x190   : > { %v466_v46 = vrot.slane %v465_v44, 2  ;;  %v486_v50 = vadd.f32 %v485_v47, %v484_v45  ;;  %v818_v41 = vadd.f32 %v817_v40, %v816_v39 }
 0x192   : > { %v467_v48 = vadd.f32 %v466_v46, %v465_v44  ;;  %v487_v53 = vrot.slane %v486_v50, 2  ;;  %v819_v42 = vmul.f32 0.0625, %v818_v41 }
 0x194   : > { %v468_v49 = vrot.slane %v467_v48, 1  ;;  %v488_v54 = vadd.f32 %v487_v53, %v486_v50 }
 0x196   : > { %v469_v51 = vadd.f32 %v468_v49, %v467_v48  ;;  %v489_v55 = vrot.slane %v488_v54, 1 }
 0x198   : > { %v503_v52 = vmax.f32 %v469_v51, 1.0  ;;  %v490_v57 = vadd.f32 %v489_v55, %v488_v54  ;;  %vm502_vm6 = vcmp.gt.f32.partialorder %v469_v51, 0.0 }
 0x19a   : > { %1270 = vrcp.f32 %v503_v52 }
 0x1a2   : > { %v424_v15 = vpop.f32.mrf.mxu1 }
 0x1a3   : > { %1196 = vmatprep.subr.mxu1 %v424_v15 }
 0x1a4   : > { %v1195_v16 = vpop.f32.mrf.mxu1  ;;  %1197 = vmatpush3.msra.mxu1 %v424_v15 }
 0x1a5   : > { %v509_v60 = vpop.permute.xlu1 %508  ;;  %1201 = vmatprep.subr.mxu1 %v1389_v11 }
 0x1a7   : > { %v1271_v58 = vpop.eup %1270 }
 0x1a8   : > { %v505_v59 = vmul.f32 %v1271_v58, %v490_v57 }
 0x1aa   : > { %v511_v62 = vsel %vm502_vm6, %v505_v59, %v509_v60 }
 0x1ab   : > { %v520_v0 = vadd.f32 %v514_v56, %v511_v62  ;;  %v521_v1 = vadd.f32 %v518_v61, %v511_v62 }
 0x1ad   : > { %vm523_vm7 = vcmp.gt.f32.partialorder %v521_v1, 0.0  ;;  %v525_v2 = vmul.f32 0.2, %v521_v1  ;;  %vm522_vm8 = vcmp.gt.f32.partialorder %v520_v0, 0.0  ;;  %v524_v3 = vmul.f32 0.2, %v520_v0 }
 0x1af   : > { %v527_v5 = vsel %vm523_vm7, %v521_v1, %v525_v2  ;;  %v526_v6 = vsel %vm522_vm8, %v520_v0, %v524_v3 }
 0x1b0   : > { %v531_v8 = vsel %vm529_vm9, %v527_v5, -9e+15  ;;  %v530_v9 = vsel %vm528_vm10, %v526_v6, -9e+15 }
 0x1b1   : > { %v535_v10 = vsel %vm460_vm5, %v531_v8, -inf  ;;  %v532_v12 = vsel %vm460_vm5, %v530_v9, -inf }
 0x1b2   : > { %536 = vmax.xlane.f32.xlu1 %v535_v10  ;;  %533 = vmax.xlane.f32.xlu0 %v532_v12 }
 0x1b6   : > { %663 = vadd.xlane.f32.xlu0 %v662_v7 }
 0x1c3   : > { %796 = vperm.xlu1 %1264, %v1521_v13  }
 0x1cc   : > { %791 = vperm.xlu0 %1266, %v1524_v14  }
 0x1ec   : > { %748 = vxpose.xlu1.b32.start.end [1/1] (short) (narrow) %v661_v4, 16 }
 0x23b   : > { %v537_v17 = vpop.xlane.xlu1 %536  ;;  %v534_v18 = vpop.xlane.xlu0 %533 }
 0x23c   : > { %v539_v19 = vsub.f32 %v531_v8, %v537_v17  ;;  %v538_v20 = vsub.f32 %v530_v9, %v534_v18 }
 0x23e   : > { %v540_v22 = vmul.f32 1.442695, %v538_v20  ;;  %v542_v23 = vmul.f32 1.442695, %v539_v19 }
 0x23f   : > { %v664_v24 = vpop.xlane.xlu0 %663  ;;  %v797_v43 = vpop.permute.xlu1 %796 }
 0x240   : > { %v666_v25 = vmax.f32 %v664_v24, 1.0  ;;  %1272 = vpow2.f32 %v540_v22  ;;  %vm665_vm11 = vcmp.gt.f32.partialorder %v664_v24, 0.0 }
 0x242   : > { %1274 = vrcp.f32 %v666_v25 }
 0x243   : > { %1276 = vpow2.f32 %v542_v23 }
 0x247   : > { %v792_v52 = vpop.permute.xlu0 %791 }
 0x24d   : > { %v1273_v29 = vpop.eup %1272 }
 0x24e   : > { %v544_v31 = vsel %vm460_vm5, %v1273_v29, 0.0 }
 0x24f   : > { %v1275_v30 = vpop.eup %1274  ;;  %545 = vadd.xlane.f32.xlu0 %v544_v31 }
 0x250   : > { %v1277_v32 = vpop.eup %1276  ;;  %v669_v34 = vmul.f32 %v1275_v30, %v661_v4 }
 0x251   : > { %v547_v36 = vsel %vm460_vm5, %v1277_v32, 0.0 }
 0x252   : > { %v1533_v35 = vsel %vm665_vm11, %v669_v34, 0.0625 }
 0x253   : > { %1137 = vst.msk [vmem:[%s1502_s30 + $0x8] sm:$0xff] %vm342_vm1, %v1533_v35  ;;  %548 = vadd.xlane.f32.xlu0 %v547_v36 }
 0x268   : > { %v764_v44 = vpop.trf.xlu1 }
 0x269   : > { %826 = vperm.xlu0 %1266, %v819_v42   ;;  %v780_v46 = vsel %vm460_vm5, %v764_v44, 0.0  ;;  %v799_v54 = vmul.f32 %v792_v52, %v764_v44  ;;  %vm846_vm14 = vcmp.gt.f32.partialorder %v764_v44, 0.0 }
 0x26b   : > { %v801_v56 = vsel %vm460_vm5, %v799_v54, 0.0 }
 0x26c   : > { %v765_v45 = vpop.trf.xlu1 }
 0x26d   : > { %1267 = vset.pattern.permute.xlu0 %v1390_v21  ;;  %v781_v47 = vsel %vm460_vm5, %v765_v45, 0.0  ;;  %v800_v53 = vmul.f32 %v797_v43, %v765_v45  ;;  %vm847_vm2 = vcmp.gt.f32.partialorder %v765_v45, 0.0 }
 0x26e   : > { %831 = vperm.xlu0 %1267, %v1524_v14   ;;  %v782_v48 = vadd.f32 %v781_v47, %v780_v46 }
 0x26f   : > { %v802_v21 = vsel %vm460_vm5, %v800_v53, 0.0 }
 0x270   : > { %v783_v49 = vrot.slane %v782_v48, 4  ;;  %v803_v58 = vadd.f32 %v802_v21, %v801_v56 }
 0x272   : > { %835 = vperm.xlu0 %1267, %v1521_v13   ;;  %v784_v50 = vadd.f32 %v783_v49, %v782_v48  ;;  %v804_v60 = vrot.slane %v803_v58, 4 }
 0x274   : > { %v785_v51 = vrot.slane %v784_v50, 2  ;;  %v805_v62 = vadd.f32 %v804_v60, %v803_v58 }
 0x276   : > { %v786_v55 = vadd.f32 %v785_v51, %v784_v50  ;;  %v806_v0 = vrot.slane %v805_v62, 2 }
 0x278   : > { %v787_v57 = vrot.slane %v786_v55, 1  ;;  %v807_v2 = vadd.f32 %v806_v0, %v805_v62 }
 0x27a   : > { %v788_v59 = vadd.f32 %v787_v57, %v786_v55  ;;  %v808_v3 = vrot.slane %v807_v2, 1 }
 0x27c   : > { %v821_v61 = vmax.f32 %v788_v59, 1.0  ;;  %v809_v6 = vadd.f32 %v808_v3, %v807_v2  ;;  %vm820_vm12 = vcmp.gt.f32.partialorder %v788_v59, 0.0 }
 0x27e   : > { %1278 = vrcp.f32 %v821_v61 }
 0x28b   : > { %v1279_v4 = vpop.eup %1278 }
 0x28c   : > { %v823_v10 = vmul.f32 %v1279_v4, %v809_v6 }
 0x2d8   : > { %v546_v63 = vpop.xlane.xlu0 %545 }
 0x2d9   : > { %1280 = vrcp.f32 %v546_v63 }
 0x2dc   : > { %v549_v1 = vpop.xlane.xlu0 %548 }
 0x2dd   : > { %1282 = vrcp.f32 %v549_v1 }
 0x2e4   : > { %v827_v5 = vpop.permute.xlu0 %826 }
 0x2e5   : > { %v829_v12 = vsel %vm820_vm12, %v823_v10, %v827_v5 }
 0x2e6   : > { %v1281_v8 = vpop.eup %1280 }
 0x2e7   : > { %v552_v9 = vmul.f32 %v1281_v8, %v1273_v29 }
 0x2e9   : > { %1198 = vmatprep.mubr.msk.f32.mxu1 %vm460_vm5, %v552_v9  ;;  %v832_v7 = vpop.permute.xlu0 %831 }
 0x2ea   : > { %v1283_v15 = vpop.eup %1282  ;;  %v838_v16 = vadd.f32 %v832_v7, %v829_v12 }
 0x2eb   : > { %v553_v17 = vmul.f32 %v1283_v15, %v1277_v32 }
 0x2ec   : > { %v842_v18 = vmul.f32 0.2, %v838_v16  ;;  %vm840_vm13 = vcmp.gt.f32.partialorder %v838_v16, 0.0 }
 0x2ed   : > { %1199 = vmatmul.mubr.msk.f32.vlgmr.msra.gmra.mxu1 %vm460_vm5, %v553_v17  ;;  %v836_v19 = vpop.permute.xlu0 %835 }
 0x2ee   : > { %1202 = vmatpush3.msra.mxu1 %v1521_v13  ;;  %v839_v20 = vadd.f32 %v836_v19, %v829_v12  ;;  %1205 = vmatprep.mubr.msk.f32.mxu1 %vm1391_vm4, %v1389_v11  ;;  %v844_v22 = vsel %vm840_vm13, %v838_v16, %v842_v18 }
 0x2ef   : > { %1203 = vmatprep.subr.mxu1 %v1389_v11  ;;  %v848_v23 = vsel %vm846_vm14, %v844_v22, -9e+15 }
 0x2f0   : > { %v843_v24 = vmul.f32 0.2, %v839_v20  ;;  %1204 = vmatpush3.msra.mxu1 %v1524_v14  ;;  %v850_v25 = vsel %vm460_vm5, %v848_v23, -inf  ;;  %vm841_vm15 = vcmp.gt.f32.partialorder %v839_v20, 0.0 }
 0x2f1   : > { %1206 = vmatmul.mubr.msk.f32.vlgmr.msra.gmra.mxu1 %vm342_vm1, %v1533_v35  ;;  %851 = vmax.xlane.f32.xlu0 %v850_v25 }
 0x2f2   : > { %v845_v13 = vsel %vm841_vm15, %v839_v20, %v843_v24 }
 0x2f3   : > { %v849_v26 = vsel %vm847_vm2, %v845_v13, -9e+15 }
 0x2f4   : > { %v853_v27 = vsel %vm460_vm5, %v849_v26, -inf }
 0x2f5   : > { %854 = vmax.xlane.f32.xlu1 %v853_v27 }
 0x37a   : > { %v852_v28 = vpop.xlane.xlu0 %851 }
 0x37b   : > { %v856_v29 = vsub.f32 %v848_v23, %v852_v28 }
 0x37d   : > { %v858_v11 = vmul.f32 1.442695, %v856_v29 }
 0x37e   : > { %v855_v30 = vpop.xlane.xlu1 %854 }
 0x37f   : > { %1284 = vpow2.f32 %v858_v11  ;;  %v857_v31 = vsub.f32 %v849_v26, %v855_v30 }
 0x381   : > { %v860_v14 = vmul.f32 1.442695, %v857_v31 }
 0x383   : > { %1286 = vpow2.f32 %v860_v14 }
 0x38c   : > { %v1285_v32 = vpop.eup %1284 }
 0x38d   : > { %v862_v33 = vsel %vm460_vm5, %v1285_v32, 0.0 }
 0x38e   : > { %863 = vadd.xlane.f32.xlu0 %v862_v33 }
 0x390   : > { %v1287_v34 = vpop.eup %1286 }
 0x391   : > { %v865_v35 = vsel %vm460_vm5, %v1287_v34, 0.0 }
 0x392   : > { %866 = vadd.xlane.f32.xlu0 %v865_v35 }
 0x3ad   : > { %v1200_v36 = vpop.f32.mrf.mxu1 }
 0x3ae   : > { %vm636_vm1 = vcmp.gt.f32.partialorder %v1200_v36, 0.0  ;;  %v638_v37 = vmul.f32 0.01, %v1200_v36 }
 0x3af   : > { %v626_v38 = vpop.f32.mrf.mxu1 }
 0x3b0   : > { %v640_v39 = vsel %vm636_vm1, %v1200_v36, %v638_v37  ;;  %vm635_vm3 = vcmp.gt.f32.partialorder %v626_v38, 0.0  ;;  %v637_v40 = vmul.f32 0.01, %v626_v38 }
 0x3b1   : > { %v642_v41 = vmul.f32 %v640_v39, %v640_v39  ;;  %v744_v42 = vpop.f32.mrf.mxu1 }
 0x3b2   : > { %v639_v43 = vsel %vm635_vm3, %v626_v38, %v637_v40  ;;  %1208 = vmatprep.subr.mxu0 %v744_v42 }
 0x3b3   : > { %v641_v44 = vmul.f32 %v639_v43, %v639_v43  ;;  %v1207_v45 = vpop.f32.mrf.mxu1  ;;  %1209 = vmatpush3.msra.mxu0 %v744_v42  ;;  %v644_v46 = vsel %vm241_vm0, %v642_v41, 0.0 }
 0x3b5   : > { %v643_v47 = vsel %vm241_vm0, %v641_v44, 0.0 }
 0x3b6   : > { %v645_v48 = vadd.f32 %v644_v46, %v643_v47 }
 0x3b8   : > { %v646_v49 = vrot.slane %v645_v48, 4 }
 0x3ba   : > { %v647_v50 = vadd.f32 %v646_v49, %v645_v48 }
 0x3bc   : > { %v648_v51 = vrot.slane %v647_v50, 2 }
 0x3be   : > { %v649_v52 = vadd.f32 %v648_v51, %v647_v50 }
 0x3c0   : > { %v650_v53 = vrot.slane %v649_v52, 1 }
 0x3c2   : > { %v651_v54 = vadd.f32 %v650_v53, %v649_v52 }
 0x3c4   : > { %v652_v55 = vmax.f32 %v651_v54, 1e-24 }
 0x3c6   : > { %1288 = vrsqrt.f32 %v652_v55 }
 0x3d3   : > { %v1289_v21 = vpop.eup %1288 }
 0x3d4   : > { %v654_v56 = vmul.f32 %v1289_v21, %v639_v43  ;;  %v655_v57 = vmul.f32 %v1289_v21, %v640_v39 }
 0x3d6   : > { %656 = vst.msk [vmem:[%s1562_s6] sm:$0xff] %vm241_vm0, %v654_v56  ;;  %657 = vst.msk [vmem:[%s1562_s6 + $0x8] sm:$0xff] %vm241_vm0, %v655_v57 }
 0x417   : > { %v864_v58 = vpop.xlane.xlu0 %863 }
 0x418   : > { %1290 = vrcp.f32 %v864_v58 }
 0x41b   : > { %v867_v59 = vpop.xlane.xlu0 %866 }
 0x41c   : > { %1292 = vrcp.f32 %v867_v59 }
 0x425   : > { %v1291_v60 = vpop.eup %1290 }
 0x426   : > { %v870_v61 = vmul.f32 %v1291_v60, %v1285_v32 }
 0x428   : > { %1210 = vmatprep.mubr.msk.f32.mxu0 %vm460_vm5, %v870_v61 }
 0x429   : > { %v1293_v62 = vpop.eup %1292 }
 0x42a   : > { %v871_v63 = vmul.f32 %v1293_v62, %v1287_v34 }
 0x42c   : > { %1211 = vmatmul.mubr.msk.f32.vlgmr.msra.gmra.mxu0 %vm460_vm5, %v871_v63 }
 0x42d   : > { %1309 = shalt.err (!%p1306_p4)
}
 0x42e   : > { %s1310_s23 = scalar_lea.hbm %s1577_s11, 256  ;;  %s1314_s30 = scalar_lea.hbm %s1665_s4, 512 }
 0x42f   : > { %p1311_p7 = scmp.ne.s32.totalorder %s1577_s11, %s1310_s23  ;;  %p1315_p10 = scmp.lt.s32.totalorder %s1577_s11, %s1665_s4 }
 0x430   : > { %p1316_p11 = scmp.lt.s32.totalorder %s1314_s30, %s1310_s23 }
 0x431   : > { %p1312_p8 = pnand %p1311_p7, %p1459_p5 }
 0x432   : > { %p1317_p12 = por %p1316_p11, %p1315_p10 }
 0x433   : > { %p1313_p9 = pneg %p1312_p8 }
 0x435   : > { %p1318_p13 = pnand %p1317_p12, %p1313_p9 }
 0x437   : > { %1321 = shalt.err (!%p1318_p13)
}
 0x438   : > { %s1393_s9 = smov 128   ;;  %s1394_s10 = smov 8  }
 0x439   : > { %1214 = dma.vmem_to_hbm [thread:$0]  (%p1459_p5), %s1571_s7, 256, %s1577_s11, %s983_s12, %s1393_s9, %s1393_s9, %s1394_s10  }
 0x43a   : > { %s1153_s7 = sshll.u32 %s1442_s19, 9  ;;  %s997_s11 = sshll.u32 %s1562_s6, 4  ;;  %s1614_s11 = int_to_ptr.vmem [resolvable:$true] %s997_s11 }
 0x43b   : > { %s1612_s14 = scalar_lea.hbm %s1664_s3, %s1153_s7  ;;  %s978_s20 = scalar_lea.sflag [#allocation3], %s1499_s28 }
 0x43c   : > { %s1322_s19 = scalar_lea.vmem %s1614_s11, 512  ;;  %s1395_s22 = smov [#allocation2]  }
 0x43d   : > { %p1323_p0 = scmp.ne.s32.totalorder %s1614_s11, %s1322_s19  ;;  %s1326_s23 = sshll.u32 %s1395_s22, 4  ;;  %s1327_s23 = int_to_ptr.vmem [resolvable:$false] %s1326_s23 }
 0x43e   : > { %s1328_s27 = scalar_lea.vmem %s1327_s23, 1024  ;;  %p1329_p3 = scmp.lt.s32.totalorder %s1614_s11, %s1327_s23 }
 0x43f   : > { %p1324_p1 = pnand %p1323_p0, %p1459_p5  ;;  %p1330_p4 = scmp.lt.s32.totalorder %s1328_s27, %s1322_s19 }
 0x441   : > { %p1325_p2 = pneg %p1324_p1  ;;  %p1331_p7 = por %p1330_p4, %p1329_p3 }
 0x443   : > { %p1332_p8 = pnand %p1331_p7, %p1325_p2 }
 0x4ec   : > { %v1212_v0 = vpop.f32.mrf.mxu0 }
 0x4ed   : > { %vm954_vm4 = vcmp.gt.f32.partialorder %v1212_v0, 0.0  ;;  %v956_v1 = vmul.f32 0.01, %v1212_v0 }
 0x4ee   : > { %v944_v2 = vpop.f32.mrf.mxu0 }
 0x4ef   : > { %v958_v3 = vsel %vm954_vm4, %v1212_v0, %v956_v1  ;;  %vm953_vm5 = vcmp.gt.f32.partialorder %v944_v2, 0.0  ;;  %v955_v4 = vmul.f32 0.01, %v944_v2 }
 0x4f0   : > { %v960_v5 = vmul.f32 %v958_v3, %v958_v3 }
 0x4f1   : > { %v957_v6 = vsel %vm953_vm5, %v944_v2, %v955_v4 }
 0x4f2   : > { %v959_v8 = vmul.f32 %v957_v6, %v957_v6  ;;  %v962_v9 = vsel %vm241_vm0, %v960_v5, 0.0 }
 0x4f4   : > { %v961_v10 = vsel %vm241_vm0, %v959_v8, 0.0 }
 0x4f5   : > { %v963_v12 = vadd.f32 %v962_v9, %v961_v10 }
 0x4f7   : > { %v964_v7 = vrot.slane %v963_v12, 4 }
 0x4f9   : > { %v965_v15 = vadd.f32 %v964_v7, %v963_v12 }
 0x4fb   : > { %v966_v16 = vrot.slane %v965_v15, 2 }
 0x4fd   : > { %v967_v17 = vadd.f32 %v966_v16, %v965_v15 }
 0x4ff   : > { %v968_v18 = vrot.slane %v967_v17, 1 }
 0x501   : > { %v969_v19 = vadd.f32 %v968_v18, %v967_v17 }
 0x503   : > { %v970_v20 = vmax.f32 %v969_v19, 1e-24 }
 0x505   : > { %1294 = vrsqrt.f32 %v970_v20 }
 0x512   : > { %v1295_v22 = vpop.eup %1294 }
 0x513   : > { %v972_v23 = vmul.f32 %v1295_v22, %v957_v6  ;;  %v973_v24 = vmul.f32 %v1295_v22, %v958_v3 }
 0x515   : > { %1141 = vst.msk [vmem:[%s1562_s6 + $0x10] sm:$0xff] %vm241_vm0, %v972_v23  ;;  %1142 = vst.msk [vmem:[%s1562_s6 + $0x18] sm:$0xff] %vm241_vm0, %v973_v24 }
 0x516   : > { %1335 = shalt.err (!%p1332_p8)
}
 0x517   : > { %s1336_s6 = scalar_lea.hbm %s1612_s14, 512  ;;  %s1340_s30 = scalar_lea.hbm %s1664_s3, 1024 }
 0x518   : > { %p1337_p9 = scmp.ne.s32.totalorder %s1612_s14, %s1336_s6  ;;  %p1341_p12 = scmp.lt.s32.totalorder %s1612_s14, %s1664_s3 }
 0x519   : > { %p1342_p13 = scmp.lt.s32.totalorder %s1340_s30, %s1336_s6 }
 0x51a   : > { %p1338_p10 = pnand %p1337_p9, %p1459_p5 }
 0x51b   : > { %p1343_p0 = por %p1342_p13, %p1341_p12 }
 0x51c   : > { %p1339_p11 = pneg %p1338_p10 }
 0x51e   : > { %p1344_p1 = pnand %p1343_p0, %p1339_p11 }
 0x520   : > { %1347 = shalt.err (!%p1344_p1)
}
 0x521   : > { %1213 = dma.vmem_to_hbm [thread:$0]  (%p1459_p5), %s1614_s11, 512, %s1612_s14, %s978_s20, %s1393_s9, %s1393_s9, %s1394_s10  }
 0x522 PF: > { %p1224_p2 = scmp.ge.s32.totalorder %s1386_s18, 2  ;;  %s1028_s7 = sand.u32 1, %s1374_s15  }
 0x523   : > { %s1029_s12 = scalar_lea.sflag [#allocation3], %s1028_s7 }
 0x524   : > { %p1218_p3 = pnand %p1224_p2, %p1463_p6 }
 0x526   : > { %p1219_p4 = pneg %p1218_p3 }
 0x528   : > { %1365 = dma.done.wait (%p1219_p4), %s1029_s12, 512  }
 0x529   : > { %1367 = vsyncadd (%p1219_p4), %s1029_s12, 4294966784  ;;  %s1038_s13 = scalar_lea.sflag [#allocation5], %s1028_s7 }
 0x52a   : > { %1369 = dma.done.wait (%p1219_p4), %s1038_s13, 256  }
 0x52b   : > { %1371 = vsyncadd (%p1219_p4), %s1038_s13, 4294967040  ;;  %p18_p5 = scmp.ge.s32.totalorder %s1446_s21, 4   ;;  %s1668_s15 = smov %s1378_s16 }
 0x52c   : > { %s1669_s16 = smov %s1382_s17  ;;  %s1670_s17 = smov %s1457_s24 }
 0x52d   : > { %s1671_s18 = smov %s1446_s21  ;;  %20 = sbr.rel (!%p18_p5) target bundleno = 5 (0x5), region = 90 }
 0x532   :  { %1043 = vsyncpa [#allocation3], 1 }
 0x533   :  { %1045 = vsyncpa [#allocation3 + $0x1], 1 }
 0x534   :  { %1046 = vsyncpa [#allocation5], 1 }
 0x535   :  { %1048 = vsyncpa [#allocation5 + $0x1], 1 }

</bundles_post_ra>
